<compile_context>
chip_gen: v6e
topology: v6e:2x2x1
jax: 0.10.0
libtpu: 0.0.40
codegen_flags: <defaults>
</compile_context>

<pallas_src>
import functools

import jax
import jax.numpy as jnp
from jax.experimental import pallas as pl
from jax.experimental.pallas import tpu as pltpu

TOPK = 128  # hardcoded k in the PyTorch module


# --------------------- hardware query / tile-size helpers --------------------
def _vmem_capacity_bytes():
    """Physical VMEM per core; falls back to 64 MiB (v7x, the smallest)."""
    try:
        info = pltpu.get_tpu_info()
        for attr in ("vmem_capacity_bytes", "vmem_size_bytes", "vmem_bytes"):
            v = getattr(info, attr, None)
            if v is None:
                continue
            v = int(v)
            if v > 0:
                return v
    except Exception:
        pass
    return 64 << 20


_VMEM_CAP = _vmem_capacity_bytes()
# Budget for the (double-buffered) pipeline blocks; leaves compiler headroom.
_VMEM_BLOCK_BUDGET = int(_VMEM_CAP * 0.55)
# Raise the scoped VMEM limit past the 16 MiB (v5e) / 32 MiB (v6e/v7x) defaults.
_VMEM_LIMIT = int(_VMEM_CAP * 0.85)
# Half-VMEM chips (v7x) have two TensorCores: split the row axis into >= 2 blocks.
_DUAL_TC_SPLIT = _VMEM_CAP <= (64 << 20)


def _round_down(x, m):
    return max(m, (x // m) * m)


def _tm_target(M):
    # Bigger row blocks amortize the weight stream (v6e HBM-balance item); on
    # dual-TensorCore chips also guarantee >= 2 row blocks when M allows it.
    t = 1024 if M >= 4096 else (512 if M >= 1024 else 256)
    if _DUAL_TC_SPLIT and M >= 16:
        t = min(t, _round_down(M // 2, 8))
    return max(8, min(t, M))


def _tile_candidates(dim, mult, targets):
    """Tile sizes that evenly divide `dim`, in preference order.  A tile must be
    a multiple of `mult` (sublane/lane granularity) unless it equals the full
    dimension, which is always a legal block extent (handles ragged sizes)."""
    cands = []
    for t in targets:
        t = min(int(t), dim)
        if t <= 0 or dim % t != 0:
            continue
        if t % mult != 0 and t != dim:
            continue
        if t not in cands:
            cands.append(t)
    if not cands:
        cands.append(dim)
    return cands


def _select_linear_tiles(M, K, N, x_bytes, w_bytes, out_bytes):
    """VMEM-budget-driven tiles for x[M,K] @ w[K,N] + b.  Preference: large tm
    (weight-stream reuse), full-K contraction (single MXU call, no revisits),
    large tn; shrinks tn/tk before tm when over budget."""
    tms = _tile_candidates(M, 8, (_tm_target(M), 1024, 512, 256, 128, 64, 32, 16, 8))
    tns = _tile_candidates(N, 128, (512, 256, 128))
    tks = _tile_candidates(K, 128, (K, 1024, 512, 256, 128))

    def cost(tm, tn, tk):
        # 2x: default double-buffering of every pipelined block; the out term
        # uses max(out_bytes, 4) to also cover the f32 accumulator variant.
        return 2 * (tm * tk * x_bytes + tk * tn * w_bytes + tn * 4
                    + tm * tn * max(out_bytes, 4))

    best, best_c = None, None
    for tm in tms:
        for tk in tks:
            for tn in tns:
                c = cost(tm, tn, tk)
                if c <= _VMEM_BLOCK_BUDGET:
                    return tm, tn, tk
                if best_c is None or c < best_c:
                    best, best_c = (tm, tn, tk), c
    return best  # nothing fits the budget: use the smallest-footprint combo


def _select_mask_decode_tiles(M, K, N, emb_bytes, enc_bytes):
    """Tiles for the fused mask+decode kernel: the contraction dim (out_feats=K)
    is tiled by tk; the (tm, in_feats=N) decode row block stays VMEM-resident."""
    tms = _tile_candidates(M, 8, (_tm_target(M), 512, 256, 128, 64, 32, 16, 8))
    tks = _tile_candidates(K, 128, (1024, 512, 256, 128))

    def cost(tm, tk):
        return 2 * (tm * tk * emb_bytes          # emb tile
                    + tm * (emb_bytes + 4)       # threshold + tie cutoff
                    + tk * N * 2 + N * 4         # W_dec slab + bias
                    + tm * tk * enc_bytes        # encoded tile (out)
                    + tm * N * 4)                # resident decode row block (out)

    best, best_c = None, None
    for tm in tms:
        for tk in tks:
            c = cost(tm, tk)
            if c <= _VMEM_BLOCK_BUDGET:
                return tm, tk, True
            if best_c is None or c < best_c:
                best, best_c = (tm, tk), c
    return best[0], best[1], False


# ------------------------- Kernel 1: linear (x @ W + b) ----------------------
def _linear_kernel(x_ref, w_ref, b_ref, o_ref):
    """Full contraction in a single MXU call per (i, j) tile (no accumulator)."""
    acc = jnp.dot(x_ref[...].astype(jnp.bfloat16), w_ref[...].astype(jnp.bfloat16),
                  preferred_element_type=jnp.float32)
    o_ref[...] = (acc + b_ref[...]).astype(o_ref.dtype)


def _linear_acc_f32_kernel(x_ref, w_ref, b_ref, o_ref):
    """K-tiled variant, f32 output: accumulate straight into o_ref (no (tm, tn)
    scratch -> saves 2x tm*tn*4 B of VMEM and the final copy)."""
    k = pl.program_id(2)
    part = jnp.dot(x_ref[...].astype(jnp.bfloat16), w_ref[...].astype(jnp.bfloat16),
                   preferred_element_type=jnp.float32)

    @pl.when(k == 0)
    def _():
        o_ref[...] = part + b_ref[...]

    @pl.when(k > 0)
    def _():
        o_ref[...] += part


def _linear_acc_cast_kernel(x_ref, w_ref, b_ref, o_ref, acc_ref):
    """K-tiled variant for non-f32 outputs: f32 scratch accumulator, single cast."""
    k = pl.program_id(2)

    @pl.when(k == 0)
    def _():
        acc_ref[...] = jnp.zeros_like(acc_ref)

    acc_ref[...] += jnp.dot(x_ref[...].astype(jnp.bfloat16),
                            w_ref[...].astype(jnp.bfloat16),
                            preferred_element_type=jnp.float32)

    @pl.when(k == pl.num_programs(2) - 1)
    def _():
        o_ref[...] = (acc_ref[...] + b_ref[...]).astype(o_ref.dtype)


def pallas_linear(x, w, b, *, out_dtype=jnp.float32, tm=None, tn=None, tk=None):
    """x: [M, K], w: [K, N] (bf16), b: [1, N] f32 -> [M, N] out_dtype."""
    M, K = x.shape
    Kw, N = w.shape
    assert K == Kw and b.shape == (1, N)
    out_bytes = jnp.dtype(out_dtype).itemsize

    if tm is None or tn is None or tk is None:
        stm, stn, stk = _select_linear_tiles(M, K, N, x.dtype.itemsize,
                                             w.dtype.itemsize, out_bytes)
        tm = stm if tm is None else tm
        tn = stn if tn is None else tn
        tk = stk if tk is None else tk
    assert M % tm == 0 and N % tn == 0 and K % tk == 0, (M, K, N, tm, tn, tk)

    out_shape = jax.ShapeDtypeStruct((M, N), out_dtype)
    cparams = pltpu.CompilerParams(
        dimension_semantics=(("parallel", "parallel") if tk == K
                             else ("parallel", "parallel", "arbitrary")),
        vmem_limit_bytes=_VMEM_LIMIT)

    if tk == K:
        return pl.pallas_call(
            _linear_kernel,
            out_shape=out_shape,
            grid_spec=pltpu.PrefetchScalarGridSpec(
                num_scalar_prefetch=0,
                grid=(M // tm, N // tn),
                in_specs=[
                    pl.BlockSpec((tm, K), lambda i, j: (i, 0)),
                    pl.BlockSpec((K, tn), lambda i, j: (0, j)),
                    pl.BlockSpec((1, tn), lambda i, j: (0, j)),
                ],
                out_specs=pl.BlockSpec((tm, tn), lambda i, j: (i, j)),
            ),
            compiler_params=cparams,
        )(x, w, b)

    if jnp.dtype(out_dtype) == jnp.float32:
        kernel, scratch = _linear_acc_f32_kernel, []
    else:
        kernel, scratch = _linear_acc_cast_kernel, [pltpu.VMEM((tm, tn), jnp.float32)]

    return pl.pallas_call(
        kernel,
        out_shape=out_shape,
        grid_spec=pltpu.PrefetchScalarGridSpec(
            num_scalar_prefetch=0,
            grid=(M // tm, N // tn, K // tk),
            in_specs=[
                pl.BlockSpec((tm, tk), lambda i, j, k: (i, k)),
                pl.BlockSpec((tk, tn), lambda i, j, k: (k, j)),
                pl.BlockSpec((1, tn), lambda i, j, k: (0, j)),
            ],
            out_specs=pl.BlockSpec((tm, tn), lambda i, j, k: (i, j)),
            scratch_shapes=scratch,
        ),
        compiler_params=cparams,
    )(x, w, b)


# -------- Kernel 2: fused exact-top-k mask + decoder (out_feats-tiled) -------
def _mask_decode_kernel(emb_ref, thr_ref, cut_ref, w_ref, b_ref,
                        enc_ref, dec_ref, *, block_k):
    kk = pl.program_id(1)

    emb = emb_ref[...]                                           # (tm, tk)
    col = jax.lax.broadcasted_iota(jnp.int32, emb.shape, 1) + kk * block_k
    # Exactly-k mask: strictly-above-threshold values plus ties at the threshold
    # up to the precomputed per-row index cutoff (VPU filler under the MXU).
    keep = (emb > thr_ref[...]) | ((emb == thr_ref[...]) & (col <= cut_ref[...]))
    enc = jnp.where(keep, emb, jnp.zeros_like(emb))
    enc_ref[...] = enc.astype(enc_ref.dtype)                     # one write per (i, kk)

    part = jnp.dot(enc.astype(jnp.bfloat16), w_ref[...],
                   preferred_element_type=jnp.float32)

    @pl.when(kk == 0)
    def _():
        dec_ref[...] = part + b_ref[...]                         # init resident row block

    @pl.when(kk > 0)
    def _():
        dec_ref[...] += part                                     # accumulate over out_feats


def pallas_mask_decode(emb, thresh, cutoff, w, b, *, tm=None, tk=None):
    """emb: [M, K] (bf16), thresh/cutoff: [M, 1], w: [K, N] bf16, b: [1, N] f32
       -> (encoded [M, K] f32, decoded [M, N] f32)."""
    M, K = emb.shape
    Kw, N = w.shape
    assert K == Kw and thresh.shape == (M, 1) and cutoff.shape == (M, 1)
    assert b.shape == (1, N)

    if tm is None or tk is None:
        stm, stk, _ = _select_mask_decode_tiles(M, K, N, emb.dtype.itemsize, 4)
        tm = stm if tm is None else tm
        tk = stk if tk is None else tk
    assert M % tm == 0 and K % tk == 0, (M, K, tm, tk)

    kernel = functools.partial(_mask_decode_kernel, block_k=tk)
    # NOTE: on 128 MiB-VMEM chips (v5e/v6e), sweeping pipeline_mode=pl.Buffered(3)
    # on the W_dec BlockSpec below is a further tuning knob once headroom allows.
    return pl.pallas_call(
        kernel,
        out_shape=(jax.ShapeDtypeStruct((M, K), jnp.float32),
                   jax.ShapeDtypeStruct((M, N), jnp.float32)),
        grid_spec=pltpu.PrefetchScalarGridSpec(
            num_scalar_prefetch=0,
            grid=(M // tm, K // tk),
            in_specs=[
                pl.BlockSpec((tm, tk), lambda i, kk: (i, kk)),   # emb tile
                pl.BlockSpec((tm, 1), lambda i, kk: (i, 0)),     # k-th value
                pl.BlockSpec((tm, 1), lambda i, kk: (i, 0)),     # tie-index cutoff
                pl.BlockSpec((tk, N), lambda i, kk: (kk, 0)),    # W_dec_t slab
                pl.BlockSpec((1, N), lambda i, kk: (0, 0)),      # b_dec
            ],
            out_specs=[
                pl.BlockSpec((tm, tk), lambda i, kk: (i, kk)),   # encoded
                pl.BlockSpec((tm, N), lambda i, kk: (i, 0)),     # decoded (resident)
            ],
        ),
        compiler_params=pltpu.CompilerParams(
            dimension_semantics=("parallel", "arbitrary"),
            vmem_limit_bytes=_VMEM_LIMIT),
    )(emb, thresh, cutoff, w, b)


# ------------------------------ Module wrapper -------------------------------
def init_params(key, in_feats, out_feats, tied_weights=True):
    """Mirrors nn.Linear init (uniform(-1/sqrt(fan_in), +)).  Weights are stored
    pre-transposed and pre-cast to bf16 (no per-forward transpose/cast; results
    differ from an f32 PyTorch reference at the ~1e-2 level)."""
    k1, k2, k3, k4 = jax.random.split(key, 4)
    be = 1.0 / (in_feats ** 0.5)
    bd = 1.0 / (out_feats ** 0.5)
    W_enc = jax.random.uniform(k1, (out_feats, in_feats), jnp.float32, -be, be)
    b_enc = jax.random.uniform(k2, (out_feats,), jnp.float32, -be, be)
    W_dec = W_enc.T if tied_weights else jax.random.uniform(
        k3, (in_feats, out_feats), jnp.float32, -bd, bd)
    b_dec = jax.random.uniform(k4, (in_feats,), jnp.float32, -bd, bd)
    return {
        "W_enc_t": W_enc.T.astype(jnp.bfloat16),   # [in_feats, out_feats]
        "b_enc": b_enc.reshape(1, -1),             # [1, out_feats] f32
        "W_dec_t": W_dec.T.astype(jnp.bfloat16),   # [out_feats, in_feats]
        "b_dec": b_dec.reshape(1, -1),             # [1, in_feats]  f32
    }


def sae_topk_forward(x, params, k=TOPK):
    """Returns (decoded_x, encoded_x, x), matching the PyTorch module."""
    W_enc_t, b_enc = params["W_enc_t"], params["b_enc"]
    W_dec_t, b_dec = params["W_dec_t"], params["b_dec"]
    M = x.shape[0]
    K_out, N_in = W_dec_t.shape

    # Encoder: emb = x @ W_enc.T + b_enc.  emb is stored bf16: it is written once
    # and re-read twice (top_k glue + mask/decode kernel), so bf16 halves its HBM
    # traffic and the (tm, tk) emb blocks in VMEM.
    emb = pallas_linear(x, W_enc_t, b_enc, out_dtype=jnp.bfloat16)

    # Per-row exact-top-k selection scalars, computed in plain JAX glue.
    # TODO(synk): torch.topk itself (sorted index selection) has no clean Pallas
    # TPU lowering; only these two per-row scalars are handed to the kernel.
    vals = jax.lax.top_k(emb, k)[0]                          # [M, k]
    thresh = vals[:, k - 1:k]                                # [M, 1] k-th largest
    n_greater = jnp.sum(vals > thresh, axis=-1, keepdims=True)
    need = (k - n_greater).astype(jnp.int32)                 # ties to keep (>= 1)
    eq_csum = jnp.cumsum((emb == thresh).astype(jnp.int32), axis=-1)
    cutoff = jnp.argmax(eq_csum >= need, axis=-1).astype(jnp.int32)[:, None]

    tm, tk, fits = _select_mask_decode_tiles(M, K_out, N_in, emb.dtype.itemsize, 4)
    if fits:
        # Fused exact-top-k mask + decoder, tiled over out_feats (the contraction
        # dim); the (tm, in_feats) decode row block stays resident across kk.
        # TODO(synk): at realistic widths (k=128 of out_feats>=32k active) a
        # sparse decode (scalar-prefetch top-k indices, DMA-gather the k active
        # W_dec rows, [rows,k]@[k,in_feats]) would cut W_dec HBM traffic and MXU
        # FLOPs by ~out_feats/k; dense masked decode kept here.
        encoded, decoded = pallas_mask_decode(emb, thresh, cutoff, W_dec_t, b_dec,
                                              tm=tm, tk=tk)
    else:
        # Unfused fallback when in_feats is too large for a resident decode row.
        col = jnp.arange(K_out, dtype=jnp.int32)[None, :]
        keep = (emb > thresh) | ((emb == thresh) & (col <= cutoff))
        encoded = jnp.where(keep, emb, 0).astype(jnp.float32)
        decoded = pallas_linear(encoded, W_dec_t, b_dec, out_dtype=jnp.float32)
    return decoded, encoded, x


# ----------------------------------- Main ------------------------------------
if __name__ == "__main__":
    B, IN_FEATS, OUT_FEATS = 8, 256, 512        # out_feats >= 128 required by topk(128)

    key = jax.random.PRNGKey(0)
    kp, kx = jax.random.split(key)
    params = init_params(kp, IN_FEATS, OUT_FEATS, tied_weights=True)
    x = jax.random.normal(kx, (B, IN_FEATS), jnp.float32)

    decoded_x, encoded_x, x_out = sae_topk_forward(x, params)
    jax.block_until_ready((decoded_x, encoded_x, x_out))

    # --- sanity checks against pure-JAX references (same bf16 weights) ---
    We = params["W_enc_t"].astype(jnp.float32)
    Wd = params["W_dec_t"].astype(jnp.float32)

    # encoder, full-contraction path (bf16 output)
    emb_kernel = pallas_linear(x, params["W_enc_t"], params["b_enc"],
                               out_dtype=jnp.bfloat16)
    emb_ref = (x @ We + params["b_enc"]).astype(jnp.bfloat16)
    assert jnp.allclose(emb_kernel.astype(jnp.float32), emb_ref.astype(jnp.float32),
                        rtol=2e-2, atol=2e-2)

    # K-tiled encoder paths: in-place f32 accumulation and f32-scratch + cast
    emb_t32 = pallas_linear(x, params["W_enc_t"], params["b_enc"],
                            out_dtype=jnp.float32, tm=8, tn=128, tk=128)
    assert jnp.allclose(emb_t32, emb_kernel.astype(jnp.float32), rtol=2e-2, atol=2e-2)
    emb_t16 = pallas_linear(x, params["W_enc_t"], params["b_enc"],
                            out_dtype=jnp.bfloat16, tm=8, tn=128, tk=128)
    assert jnp.allclose(emb_t16.astype(jnp.float32), emb_kernel.astype(jnp.float32),
                        rtol=2e-2, atol=2e-2)

    # exactly k active features per row (tie-aware exact top-k mask)
    nnz = jnp.sum(encoded_x != 0, axis=-1)
    assert int(jnp.min(nnz)) == TOPK and int(jnp.max(nnz)) == TOPK

    # encoded matches the exact-top-k mask applied to the kernel's own emb
    vals = jax.lax.top_k(emb_kernel, TOPK)[0]
    thr = vals[:, TOPK - 1:TOPK]
    n_gt = jnp.sum(vals > thr, axis=-1, keepdims=True)
    eq_cs = jnp.cumsum((emb_kernel == thr).astype(jnp.int32), axis=-1)
    cut = jnp.argmax(eq_cs >= (TOPK - n_gt), axis=-1).astype(jnp.int32)[:, None]
    cols = jnp.arange(OUT_FEATS, dtype=jnp.int32)[None, :]
    keep = (emb_kernel > thr) | ((emb_kernel == thr) & (cols <= cut))
    enc_ref = jnp.where(keep, emb_kernel.astype(jnp.float32), 0.0)
    assert jnp.allclose(encoded_x, enc_ref, rtol=1e-6, atol=1e-6)

    # decoder consistency using the kernel's own encoded output
    dec_ref = encoded_x @ Wd + params["b_dec"]
    assert jnp.allclose(decoded_x, dec_ref, rtol=2e-2, atol=2e-2)

    # out_feats-tiled fused path with multiple kk steps: exercises the resident
    # decode row-block accumulation and the per-kk encoded writes
    enc2, dec2 = pallas_mask_decode(emb_kernel, thr, cut, params["W_dec_t"],
                                    params["b_dec"], tm=8, tk=128)
    assert jnp.array_equal(enc2, encoded_x)
    assert jnp.allclose(dec2, decoded_x, rtol=1e-3, atol=1e-3)

    assert decoded_x.shape == (B, IN_FEATS)
    assert encoded_x.shape == (B, OUT_FEATS)
    assert jnp.array_equal(x_out, x)

    print("KERNEL_OK")
</pallas_src>

<mosaic_0001>
module attributes {stable_mosaic.version = 11 : i64} {
  func.func @_linear_kernel(%arg0: i32, %arg1: i32, %arg2: memref<8x256xf32, #tpu.memory_space<vmem>>, %arg3: memref<256x512xbf16, #tpu.memory_space<vmem>>, %arg4: memref<1x512xf32, #tpu.memory_space<vmem>>, %arg5: memref<8x512xbf16, #tpu.memory_space<vmem>>) attributes {dimension_semantics = [#tpu.dimension_semantics<parallel>, #tpu.dimension_semantics<parallel>], iteration_bounds = array<i64: 1, 1>, scalar_prefetch = 0 : i64, scratch_operands = 0 : i64, tpu.core_type = #tpu.core_type<tc>, window_params = [{transform_indices = @transform_0, window_bounds = array<i64: 8, 256>}, {transform_indices = @transform_1, window_bounds = array<i64: 256, 512>}, {transform_indices = @transform_2, window_bounds = array<i64: 1, 512>}, {transform_indices = @transform_3, window_bounds = array<i64: 8, 512>}]} {
    %c0 = arith.constant 0 : index
    %c0_0 = arith.constant 0 : index
    %0 = vector.load %arg2[%c0, %c0_0] : memref<8x256xf32, #tpu.memory_space<vmem>>, vector<8x256xf32>
    %1 = arith.truncf %0 : vector<8x256xf32> to vector<8x256xbf16>
    %c0_1 = arith.constant 0 : index
    %c0_2 = arith.constant 0 : index
    %2 = vector.load %arg3[%c0_1, %c0_2] : memref<256x512xbf16, #tpu.memory_space<vmem>>, vector<256x512xbf16>
    %cst = arith.constant dense<0.000000e+00> : vector<8x512xf32>
    %3 = tpu.matmul %1, %2, %cst {dimension_numbers = #tpu.dot_dimension_numbers<[1], [0], [0], [1], [0, 0, 1, 1], [], []>} : vector<8x256xbf16>, vector<256x512xbf16>, vector<8x512xf32> -> vector<8x512xf32>
    %c0_3 = arith.constant 0 : index
    %c0_4 = arith.constant 0 : index
    %4 = vector.load %arg4[%c0_3, %c0_4] : memref<1x512xf32, #tpu.memory_space<vmem>>, vector<1x512xf32>
    %5 = vector.broadcast %4 : vector<1x512xf32> to vector<8x512xf32>
    %6 = arith.addf %3, %5 : vector<8x512xf32>
    %7 = arith.truncf %6 : vector<8x512xf32> to vector<8x512xbf16>
    %c0_5 = arith.constant 0 : index
    %c0_6 = arith.constant 0 : index
    %8 = vector.load %arg5[%c0_5, %c0_6] : memref<8x512xbf16, #tpu.memory_space<vmem>>, vector<8x512xbf16>
    tpu.vector_store %arg5[%c0_5, %c0_6], %7 {strides = array<i32>} : memref<8x512xbf16, #tpu.memory_space<vmem>>, vector<8x512xbf16>,
    return
  }
  func.func @transform_0(%arg0: i32, %arg1: i32) -> (i32, i32) {
    %c0_i32 = arith.constant 0 : i32
    %c0_i32_0 = arith.constant 0 : i32
    return %arg0, %c0_i32 : i32, i32
  }
  func.func @transform_1(%arg0: i32, %arg1: i32) -> (i32, i32) {
    %c0_i32 = arith.constant 0 : i32
    %c0_i32_0 = arith.constant 0 : i32
    return %c0_i32, %arg1 : i32, i32
  }
  func.func @transform_2(%arg0: i32, %arg1: i32) -> (i32, i32) {
    %c0_i32 = arith.constant 0 : i32
    %c0_i32_0 = arith.constant 0 : i32
    return %c0_i32, %arg1 : i32, i32
  }
  func.func @transform_3(%arg0: i32, %arg1: i32) -> (i32, i32) {
    %c0_i32 = arith.constant 0 : i32
    return %arg0, %arg1 : i32, i32
  }
}

</mosaic_0001>

<bundles_post_ra>
// kernel: tpu_custom_call.1
= control target key start
LH: loop header
LB: loop body
LE: loop exit
PB: predicated region body
PF: predicated region fallthrough
CT: control target
= control target key end

     0   :  { %8 = vsyncpa [#allocation3], 0  ;;  %s872_s0 = inlined_call_operand.hbm [shape: f32[8,256], index: 0, kind: input, shape index: {}]   ;;  %s873_s1 = inlined_call_operand.hbm [shape: bf16[256,512], index: 1, kind: input, shape index: {}]   ;;  %s874_s2 = inlined_call_operand.hbm [shape: f32[1,512], index: 2, kind: input, shape index: {}]   ;;  %s875_s3 = inlined_call_operand.hbm [shape: bf16[8,512], index: 3, kind: output, shape index: {}]  }
   0x1   :  { %9 = vsyncpa [#allocation6], 0 }
   0x2   :  { %10 = vsyncpa [#allocation4], 0  ;;  %s834_s12 = smov [#allocation5]  }
   0x3   :  { %s26_s13 = sshll.u32 %s834_s12, 4  ;;  %s27_s13 = int_to_ptr.vmem [resolvable:$true] %s26_s13 }
   0x4   :  { %s756_s14 = scalar_lea.vmem %s27_s13, 8192  ;;  %p761_p1 = scmp.lt.s32.totalorder %s27_s13, %s27_s13 }
   0x5   :  { %p757_p0 = scmp.ne.s32.totalorder %s27_s13, %s756_s14  ;;  %p762_p2 = scmp.lt.s32.totalorder %s756_s14, %s756_s14 }
   0x7   :  { %p763_p3 = por %p762_p2, %p761_p1 }
   0x9   :  { %p764_p4 = pnand %p763_p3, %p757_p0 }
   0xb   :  { %767 = shalt.err (!%p764_p4)
}
   0xc   :  { %s835_s15 = smov 256   ;;  %s836_s16 = smov 16  }
   0xd   :  { %32 = dma.hbm_to_vmem [thread:$0]  %s873_s1, 8192, %s27_s13, [#allocation6], %s835_s15, %s835_s15, %s836_s16  }
   0xe   :  { %s837_s19 = smov [#allocation2]   ;;  %s838_s21 = smov [#allocation7]  }
   0xf   :  { %s17_s20 = sshll.u32 %s837_s19, 4  ;;  %s39_s22 = sshll.u32 %s838_s21, 4  ;;  %s18_s20 = int_to_ptr.vmem [resolvable:$true] %s17_s20  ;;  %s40_s22 = int_to_ptr.vmem [resolvable:$true] %s39_s22 }
  0x10   :  { %s776_s23 = scalar_lea.vmem %s18_s20, 256  ;;  %p781_p6 = scmp.lt.s32.totalorder %s18_s20, %s18_s20 }
  0x11   :  { %p777_p5 = scmp.ne.s32.totalorder %s18_s20, %s776_s23  ;;  %p782_p7 = scmp.lt.s32.totalorder %s776_s23, %s776_s23 }
  0x13   :  { %p783_p8 = por %p782_p7, %p781_p6 }
  0x15   :  { %p784_p9 = pnand %p783_p8, %p777_p5 }
  0x17   :  { %787 = shalt.err (!%p784_p9)
}
  0x18   :  { %20 = dma.hbm_to_vmem [thread:$0]  %s872_s0, 256, %s18_s20, [#allocation3]  }
  0x19   :  { %s796_s26 = scalar_lea.vmem %s40_s22, 64  ;;  %p801_p11 = scmp.lt.s32.totalorder %s40_s22, %s40_s22 }
  0x1a   :  { %p797_p10 = scmp.ne.s32.totalorder %s40_s22, %s796_s26  ;;  %p802_p12 = scmp.lt.s32.totalorder %s796_s26, %s796_s26 }
  0x1c   :  { %p803_p13 = por %p802_p12, %p801_p11 }
  0x1e   :  { %p804_p0 = pnand %p803_p13, %p797_p10 }
  0x20   :  { %807 = shalt.err (!%p804_p0)
}
  0x21   :  { %42 = dma.hbm_to_vmem [thread:$0]  %s874_s2, 64, %s40_s22, [#allocation6]  }
  0x22   :  { %828 = dma.done.wait [#allocation3], 256  }
  0x23   :  { %829 = vsyncadd [#allocation3], 4294967040 }
  0x24   :  { %830 = dma.done.wait [#allocation6], 8256  }
  0x25   :  { %831 = vsyncadd [#allocation6], 4294959040  ;;  %v652_v0 = vld [vmem:[#allocation5 + $0xe4] ss:$16 sps:$4 sm:$0xff]   ;;  %v654_v1 = vld [vmem:[#allocation5 + $0xec] ss:$16 sps:$4 sm:$0xff]  }
  0x26   :  { %462 = vmatprep.subr.bf16.mxu0 %v652_v0  ;;  %v656_v2 = vld [vmem:[#allocation5 + $0xe0] ss:$16 sps:$4 sm:$0xff]   ;;  %v657_v3 = vld [vmem:[#allocation5 + $0xe8] ss:$16 sps:$4 sm:$0xff]   ;;  %503 = vmatprep.subr.bf16.mxu1 %v654_v1  ;;  %v658_v4 = vld [vmem:[#allocation5 + $0xc4] ss:$16 sps:$4 sm:$0xff]  }
  0x27   :  { %463 = vmatpush1.bf16.msra.mxu0 %v656_v2  ;;  %504 = vmatpush1.bf16.msra.mxu1 %v657_v3  ;;  %v660_v5 = vld [vmem:[#allocation5 + $0xcc] ss:$16 sps:$4 sm:$0xff]   ;;  %v662_v6 = vld [vmem:[#allocation5 + $0xc0] ss:$16 sps:$4 sm:$0xff]   ;;  %v663_v7 = vld [vmem:[#allocation5 + $0xc8] ss:$16 sps:$4 sm:$0xff]  }
  0x28   :  { %464 = vmatprep.subr.bf16.mxu0 %v658_v4  ;;  %505 = vmatprep.subr.bf16.mxu1 %v660_v5  ;;  %v664_v8 = vld [vmem:[#allocation5 + $0xa4] ss:$16 sps:$4 sm:$0xff]   ;;  %v666_v9 = vld [vmem:[#allocation5 + $0xac] ss:$16 sps:$4 sm:$0xff]   ;;  %v668_v10 = vld [vmem:[#allocation5 + $0xa0] ss:$16 sps:$4 sm:$0xff]   ;;  %v122_v4 = vlaneseq }
  0x29   :  { %v669_v11 = vld [vmem:[#allocation5 + $0xa8] ss:$16 sps:$4 sm:$0xff]   ;;  %v670_v12 = vld [vmem:[#allocation5 + $0x84] ss:$16 sps:$4 sm:$0xff]   ;;  %v672_v13 = vld [vmem:[#allocation5 + $0x8c] ss:$16 sps:$4 sm:$0xff]  }
  0x2a   :  { %v674_v14 = vld [vmem:[#allocation5 + $0x80] ss:$16 sps:$4 sm:$0xff]   ;;  %v675_v15 = vld [vmem:[#allocation5 + $0x88] ss:$16 sps:$4 sm:$0xff]   ;;  %v676_v16 = vld [vmem:[#allocation5 + $0x64] ss:$16 sps:$4 sm:$0xff]  }
  0x2b   :  { %465 = vmatpush1.bf16.msra.mxu0 %v662_v6  ;;  %506 = vmatpush1.bf16.msra.mxu1 %v663_v7  ;;  %v678_v17 = vld [vmem:[#allocation5 + $0x6c] ss:$16 sps:$4 sm:$0xff]   ;;  %v680_v18 = vld [vmem:[#allocation5 + $0x60] ss:$16 sps:$4 sm:$0xff]   ;;  %v681_v19 = vld [vmem:[#allocation5 + $0x68] ss:$16 sps:$4 sm:$0xff]  }
  0x2c   :  { %466 = vmatprep.subr.bf16.mxu0 %v664_v8  ;;  %507 = vmatprep.subr.bf16.mxu1 %v666_v9  ;;  %v682_v20 = vld [vmem:[#allocation5 + $0x44] ss:$16 sps:$4 sm:$0xff]   ;;  %v684_v21 = vld [vmem:[#allocation5 + $0x4c] ss:$16 sps:$4 sm:$0xff]   ;;  %v686_v22 = vld [vmem:[#allocation5 + $0x40] ss:$16 sps:$4 sm:$0xff]  }
  0x2d   :  { %v687_v23 = vld [vmem:[#allocation5 + $0x48] ss:$16 sps:$4 sm:$0xff]   ;;  %v688_v24 = vld [vmem:[#allocation5 + $0x24] ss:$16 sps:$4 sm:$0xff]   ;;  %v690_v25 = vld [vmem:[#allocation5 + $0x2c] ss:$16 sps:$4 sm:$0xff]  }
  0x2e   :  { %v692_v26 = vld [vmem:[#allocation5 + $0x20] ss:$16 sps:$4 sm:$0xff]   ;;  %v693_v27 = vld [vmem:[#allocation5 + $0x28] ss:$16 sps:$4 sm:$0xff]   ;;  %v694_v28 = vld [vmem:[#allocation5 + $0x4] ss:$16 sps:$4 sm:$0xff]  }
  0x2f   :  { %467 = vmatpush1.bf16.msra.mxu0 %v668_v10  ;;  %508 = vmatpush1.bf16.msra.mxu1 %v669_v11  ;;  %v696_v29 = vld [vmem:[#allocation5 + $0xc] ss:$16 sps:$4 sm:$0xff]   ;;  %v698_v30 = vld [vmem:[#allocation5] ss:$16 sps:$4 sm:$0xff]   ;;  %v699_v31 = vld [vmem:[#allocation5 + $0x8] ss:$16 sps:$4 sm:$0xff]  }
  0x30   :  { %468 = vmatprep.subr.bf16.mxu0 %v670_v12  ;;  %509 = vmatprep.subr.bf16.mxu1 %v672_v13  ;;  %v700_v32 = vld [vmem:[#allocation5 + $0x1e4] ss:$16 sps:$4 sm:$0xff]   ;;  %v702_v33 = vld [vmem:[#allocation5 + $0x1ec] ss:$16 sps:$4 sm:$0xff]   ;;  %v704_v34 = vld [vmem:[#allocation5 + $0x1e0] ss:$16 sps:$4 sm:$0xff]  }
  0x31   :  { %v705_v35 = vld [vmem:[#allocation5 + $0x1e8] ss:$16 sps:$4 sm:$0xff]   ;;  %v706_v36 = vld [vmem:[#allocation5 + $0x1c4] ss:$16 sps:$4 sm:$0xff]   ;;  %v708_v37 = vld [vmem:[#allocation5 + $0x1cc] ss:$16 sps:$4 sm:$0xff]  }
  0x32   :  { %v710_v38 = vld [vmem:[#allocation5 + $0x1c0] ss:$16 sps:$4 sm:$0xff]   ;;  %v711_v39 = vld [vmem:[#allocation5 + $0x1c8] ss:$16 sps:$4 sm:$0xff]   ;;  %v712_v40 = vld [vmem:[#allocation5 + $0x1a4] ss:$16 sps:$4 sm:$0xff]  }
  0x33   :  { %469 = vmatpush1.bf16.msra.mxu0 %v674_v14  ;;  %510 = vmatpush1.bf16.msra.mxu1 %v675_v15  ;;  %v714_v41 = vld [vmem:[#allocation5 + $0x1ac] ss:$16 sps:$4 sm:$0xff]   ;;  %v716_v42 = vld [vmem:[#allocation5 + $0x1a0] ss:$16 sps:$4 sm:$0xff]   ;;  %v717_v43 = vld [vmem:[#allocation5 + $0x1a8] ss:$16 sps:$4 sm:$0xff]  }
  0x34   :  { %470 = vmatprep.subr.bf16.mxu0 %v676_v16  ;;  %511 = vmatprep.subr.bf16.mxu1 %v678_v17  ;;  %v718_v44 = vld [vmem:[#allocation5 + $0x184] ss:$16 sps:$4 sm:$0xff]   ;;  %v720_v45 = vld [vmem:[#allocation5 + $0x18c] ss:$16 sps:$4 sm:$0xff]   ;;  %v722_v48 = vld [vmem:[#allocation5 + $0x180] ss:$16 sps:$4 sm:$0xff]  }
  0x35   :  { %v53_v46 = vld [vmem:[#allocation2 + $0x8] sm:$0xff]  ;;  %v724_v50 = vld [vmem:[#allocation5 + $0x164] ss:$16 sps:$4 sm:$0xff]   ;;  %v728_v52 = vld [vmem:[#allocation5 + $0x160] ss:$16 sps:$4 sm:$0xff]   ;;  %v123_v5 = vshrl.u32 %v122_v4, 7 }
  0x36   :  { %v55_v47 = vpack.c.bf16 %v53_v46, %v53_v46  ;;  %v723_v49 = vld [vmem:[#allocation5 + $0x188] ss:$16 sps:$4 sm:$0xff]   ;;  %v726_v51 = vld [vmem:[#allocation5 + $0x16c] ss:$16 sps:$4 sm:$0xff]   ;;  %v730_v54 = vld [vmem:[#allocation5 + $0x144] ss:$16 sps:$4 sm:$0xff]  }
  0x37   :  { %471 = vmatpush1.bf16.msra.mxu0 %v680_v18  ;;  %512 = vmatpush1.bf16.msra.mxu1 %v681_v19  ;;  %v729_v53 = vld [vmem:[#allocation5 + $0x168] ss:$16 sps:$4 sm:$0xff]   ;;  %v732_v55 = vld [vmem:[#allocation5 + $0x14c] ss:$16 sps:$4 sm:$0xff]   ;;  %v734_v56 = vld [vmem:[#allocation5 + $0x140] ss:$16 sps:$4 sm:$0xff]  }
  0x38   :  { %472 = vmatprep.subr.bf16.mxu0 %v682_v20  ;;  %513 = vmatprep.subr.bf16.mxu1 %v684_v21  ;;  %v735_v57 = vld [vmem:[#allocation5 + $0x148] ss:$16 sps:$4 sm:$0xff]   ;;  %v736_v58 = vld [vmem:[#allocation5 + $0x124] ss:$16 sps:$4 sm:$0xff]   ;;  %v738_v59 = vld [vmem:[#allocation5 + $0x12c] ss:$16 sps:$4 sm:$0xff]  }
  0x39   :  { %494 = vmatprep.mubr.bf16.mxu0 %v55_v47  ;;  %535 = vmatprep.mubr.bf16.mxu1 %v55_v47  ;;  %v740_v60 = vld [vmem:[#allocation5 + $0x120] ss:$16 sps:$4 sm:$0xff]   ;;  %v741_v61 = vld [vmem:[#allocation5 + $0x128] ss:$16 sps:$4 sm:$0xff]   ;;  %v742_v62 = vld [vmem:[#allocation5 + $0x104] ss:$16 sps:$4 sm:$0xff]  }
  0x3a   :  { %v744_v63 = vld [vmem:[#allocation5 + $0x10c] ss:$16 sps:$4 sm:$0xff]   ;;  %v746_v0 = vld [vmem:[#allocation5 + $0x100] ss:$16 sps:$4 sm:$0xff]   ;;  %v747_v1 = vld [vmem:[#allocation5 + $0x108] ss:$16 sps:$4 sm:$0xff]  }
  0x3b   :  { %473 = vmatpush1.bf16.msra.mxu0 %v686_v22  ;;  %514 = vmatpush1.bf16.msra.mxu1 %v687_v23  ;;  %v52_v2 = vld [vmem:[#allocation2] sm:$0xff]  ;;  %v124_v6 = vsub.s32 0, %v123_v5  ;;  %v132_v7 = vsub.s32 2, %v123_v5  ;;  %v128_v8 = vsub.s32 1, %v123_v5  ;;  %v136_v9 = vsub.s32 3, %v123_v5  ;;  %s839_s0 = smov [#allocation8]  }
  0x3c   :  { %474 = vmatprep.subr.bf16.mxu0 %v688_v24  ;;  %515 = vmatprep.subr.bf16.mxu1 %v690_v25  ;;  %v54_v3 = vpack.c.bf16 %v52_v2, %v52_v2  ;;  %v120_v10 = vld [vmem:[#allocation7] sm:$0xf]  ;;  %s568_s2 = sshll.u32 %s839_s0, 4  ;;  %s569_s2 = int_to_ptr.vmem [resolvable:$true] %s568_s2 }
  0x3d   :  { %v125_v11 = vrot.slane %v120_v10, %v124_v6  ;;  %v133_v12 = vrot.slane %v120_v10, %v132_v7  ;;  %v129_v13 = vrot.slane %v120_v10, %v128_v8  ;;  %v137_v14 = vrot.slane %v120_v10, %v136_v9  ;;  %s808_s28 = scalar_lea.vmem %s569_s2, 256  ;;  %p813_p2 = scmp.lt.s32.totalorder %s569_s2, %s569_s2 }
  0x3e   :  { %p809_p1 = scmp.ne.s32.totalorder %s569_s2, %s808_s28  ;;  %p814_p3 = scmp.lt.s32.totalorder %s808_s28, %s808_s28 }
  0x3f   :  { %475 = vmatpush1.bf16.msra.mxu0 %v692_v26  ;;  %516 = vmatpush1.bf16.msra.mxu1 %v693_v27 }
  0x40   :  { %476 = vmatprep.subr.bf16.mxu0 %v694_v28  ;;  %517 = vmatprep.subr.bf16.mxu1 %v696_v29  ;;  %p815_p4 = por %p814_p3, %p813_p2 }
  0x42   :  { %p816_p5 = pnand %p815_p4, %p809_p1 }
  0x43   :  { %477 = vmatpush1.bf16.msra.mxu0 %v698_v30  ;;  %518 = vmatpush1.bf16.msra.mxu1 %v699_v31 }
  0x44   :  { %478 = vmatprep.subr.bf16.mxu0 %v700_v32  ;;  %519 = vmatprep.subr.bf16.mxu1 %v702_v33 }
  0x47   :  { %479 = vmatpush2.bf16.msra.mxu0 %v704_v34  ;;  %520 = vmatpush2.bf16.msra.mxu1 %v705_v35 }
  0x48   :  { %480 = vmatprep.subr.bf16.mxu0 %v706_v36  ;;  %521 = vmatprep.subr.bf16.mxu1 %v708_v37 }
  0x4b   :  { %481 = vmatpush2.bf16.msra.mxu0 %v710_v38  ;;  %522 = vmatpush2.bf16.msra.mxu1 %v711_v39 }
  0x4c   :  { %482 = vmatprep.subr.bf16.mxu0 %v712_v40  ;;  %523 = vmatprep.subr.bf16.mxu1 %v714_v41 }
  0x4f   :  { %483 = vmatpush2.bf16.msra.mxu0 %v716_v42  ;;  %524 = vmatpush2.bf16.msra.mxu1 %v717_v43 }
  0x50   :  { %484 = vmatprep.subr.bf16.mxu0 %v718_v44  ;;  %525 = vmatprep.subr.bf16.mxu1 %v720_v45 }
  0x53   :  { %485 = vmatpush2.bf16.msra.mxu0 %v722_v48  ;;  %526 = vmatpush2.bf16.msra.mxu1 %v723_v49 }
  0x54   :  { %486 = vmatprep.subr.bf16.mxu0 %v724_v50  ;;  %527 = vmatprep.subr.bf16.mxu1 %v726_v51 }
  0x57   :  { %487 = vmatpush2.bf16.msra.mxu0 %v728_v52  ;;  %528 = vmatpush2.bf16.msra.mxu1 %v729_v53 }
  0x58   :  { %488 = vmatprep.subr.bf16.mxu0 %v730_v54  ;;  %529 = vmatprep.subr.bf16.mxu1 %v732_v55 }
  0x5b   :  { %489 = vmatpush2.bf16.msra.mxu0 %v734_v56  ;;  %530 = vmatpush2.bf16.msra.mxu1 %v735_v57 }
  0x5c   :  { %490 = vmatprep.subr.bf16.mxu0 %v736_v58  ;;  %531 = vmatprep.subr.bf16.mxu1 %v738_v59 }
  0x5f   :  { %491 = vmatpush2.bf16.msra.mxu0 %v740_v60  ;;  %532 = vmatpush2.bf16.msra.mxu1 %v741_v61 }
  0x60   :  { %492 = vmatprep.subr.bf16.mxu0 %v742_v62  ;;  %533 = vmatprep.subr.bf16.mxu1 %v744_v63 }
  0x63   :  { %493 = vmatpush2.bf16.msra.mxu0 %v746_v0  ;;  %534 = vmatpush2.bf16.msra.mxu1 %v747_v1 }
  0x66   :  { %495 = vmatmul.mubr.bf16.vlgmr.msra.gmra.mxu0 %v54_v3  ;;  %536 = vmatmul.mubr.bf16.vlgmr.msra.gmra.mxu1 %v54_v3 }
 0x126   :  { %v496_v15 = vpop.f32.mrf.mxu0  ;;  %v537_v16 = vpop.f32.mrf.mxu1 }
 0x127   :  { %v497_v19 = vadd.f32 %v496_v15, %v125_v11  ;;  %v538_v20 = vadd.f32 %v537_v16, %v133_v12 }
 0x128   :  { %v498_v17 = vpop.f32.mrf.mxu0  ;;  %v539_v18 = vpop.f32.mrf.mxu1 }
 0x129   :  { %v499_v21 = vadd.f32 %v498_v17, %v129_v13  ;;  %v540_v22 = vadd.f32 %v539_v18, %v137_v14 }
 0x12a   :  { %v500_v23 = vpop.f32.mrf.mxu0  ;;  %v541_v24 = vpop.f32.mrf.mxu1 }
 0x12b   :  { %v644_v25 = vpack.c.bf16 %v499_v21, %v497_v19  ;;  %v645_v26 = vpack.c.bf16 %v540_v22, %v538_v20 }
 0x12c   :  { %v501_v27 = vpop.f32.mrf.mxu0  ;;  %v542_v28 = vpop.f32.mrf.mxu1 }
 0x12d   :  { %560 = vst [vmem:[#allocation8] sm:$0xff] %v644_v25  ;;  %561 = vst [vmem:[#allocation8 + $0x8] sm:$0xff] %v645_v26 }
 0x12e   :  { %819 = shalt.err (!%p816_p5)
}
 0x12f   :  { %571 = dma.vmem_to_hbm [thread:$0]  %s569_s2, 256, %s875_s3, [#allocation4]  }
 0x130   :  { %832 = dma.done.wait [#allocation4], 256  }
 0x131   :  { %833 = vsyncadd [#allocation4], 4294967040 }
 0x132   :  { %575 = vsyncpa [#allocation3], 1 }
 0x133   :  { %576 = vsyncpa [#allocation6], 1 }
 0x134   :  { %577 = vsyncpa [#allocation4], 1 }

</bundles_post_ra>
